<compile_context>
chip_gen: v7x
topology: tpu7x:2x2x1
jax: 0.10.0
libtpu: 0.0.40
codegen_flags: <defaults>
</compile_context>

<pallas_src>
import jax
import jax.numpy as jnp
from jax.experimental import pallas as pl
from jax.experimental.pallas import tpu as pltpu


def _round_up(x, m):
    return (x + m - 1) // m * m


def _choose_p_tiling(P, B, max_tile=1024):
    """Pick (tile_p, P_pad) jointly minimizing padded rows and per-grid-step overhead.

    tile_p is a multiple of 16 (bf16 sublane packing). Cost model: total padded rows of
    MXU/DMA work plus ~256 'equivalent rows' of fixed overhead per grid step (~0.35 us).
    Configurations with fewer than 2 total parallel steps are heavily penalized so both
    v7x TensorCores stay busy whenever the problem allows it.
    """
    P16 = _round_up(P, 16)
    step_cost = 256          # per-grid-step overhead expressed in equivalent matmul rows
    best = None
    for tile in range(16, min(max_tile, P16) + 1, 16):
        p_pad = _round_up(P, tile)
        steps = B * (p_pad // tile)
        cost = p_pad + steps * step_cost
        if steps < 2:
            cost += 10 ** 9  # strongly prefer >= 2 parallel steps (v7x dual TC)
        key = (cost, -tile)
        if best is None or key < best[0]:
            best = (key, tile, p_pad)
    return best[1], best[2]


def _cls_head_kernel(x_ref, w_ref, b_ref, qT_ref, out_ref):
    # x_ref:  (1, TILE_P, Hp)  f32 or bf16 (cast to bf16 here)
    # w_ref:  (Hp, Dp) bf16    b_ref: (1, Dp) f32
    # qT_ref: (1, Dp, Qp) bf16 (normalized queries, pre-transposed in the wrapper)
    # out_ref:(1, TILE_P, Qp) f32
    x = x_ref[0].astype(jnp.bfloat16)              # (TILE_P, Hp) bf16
    w = w_ref[...]                                 # (Hp, Dp)     bf16
    b = b_ref[...]                                 # (1, Dp)      f32

    # dense0: Linear(H -> D). bf16 MXU inputs, f32 accumulation.
    img = jnp.dot(x, w, preferred_element_type=jnp.float32) + b      # (TILE_P, Dp) f32

    # image side: img / (||img|| + 1e-6); reciprocal on the EUP slot, reduction in f32.
    sumsq = jnp.sum(img * img, axis=-1, keepdims=True)
    inv = pl.reciprocal(jnp.sqrt(sumsq) + 1e-6, approx=True)
    img = (img * inv).astype(jnp.bfloat16)                            # (TILE_P, Dp) bf16

    # pred_sims = img @ q^T, queries already in (Dp, Qp) MXU weight order.
    qT = qT_ref[0]                                                    # (Dp, Qp) bf16
    out = jnp.dot(img, qT, preferred_element_type=jnp.float32)        # (TILE_P, Qp) f32
    out_ref[0] = out.astype(out_ref.dtype)


def class_prediction_head(image_embeds, query_embeds, w_t, bias):
    """image_embeds: (B, P, H) f32; query_embeds: (B, Q, D) f32;
       w_t: (H, D) f32 (dense0.weight transposed); bias: (D,) f32.
       Returns (None, pred_sims) with pred_sims: (B, P, Q) f32."""
    B, P, H = image_embeds.shape
    B2, Q, D = query_embeds.shape
    assert B == B2 and w_t.shape == (H, D) and bias.shape == (D,)

    # Query-side normalization hoisted out of the kernel (tiny). NOTE: eps is added AFTER
    # the division, faithfully matching PyTorch -> a zero-norm query row yields inf/nan.
    qf = query_embeds.astype(jnp.float32)
    q_norm = jnp.sqrt(jnp.sum(qf * qf, axis=-1, keepdims=True))
    q_normed = qf / q_norm + 1e-6

    # Lane dims -> multiples of 128 (dense vregs / unmasked stores). Zero padding is
    # mathematically inert (padded cols/rows contribute exactly 0) and sliced off at the end.
    H_pad = _round_up(H, 128)
    D_pad = _round_up(D, 128)
    Q_pad = _round_up(Q, 128)
    tile_p, P_pad = _choose_p_tiling(P, B)

    # Image slab: avoid a materialized pad/cast HBM round trip when already aligned;
    # the in-kernel bf16 cast handles either dtype.
    if P_pad == P and H_pad == H:
        x_p = image_embeds
    else:
        x_p = jnp.pad(image_embeds,
                      ((0, 0), (0, P_pad - P), (0, H_pad - H))).astype(jnp.bfloat16)

    if H_pad == H and D_pad == D:
        w_p = w_t.astype(jnp.bfloat16)
    else:
        w_p = jnp.pad(w_t, ((0, H_pad - H), (0, D_pad - D))).astype(jnp.bfloat16)
    b_p = jnp.pad(bias, (0, D_pad - D)).reshape(1, D_pad).astype(jnp.float32)

    # Pre-transpose queries to MXU weight order (B, D_pad, Q_pad): no per-tile relayout.
    qT = jnp.swapaxes(q_normed, 1, 2)                                  # (B, D, Q)
    qT_p = jnp.pad(qT, ((0, 0), (0, D_pad - D), (0, Q_pad - Q))).astype(jnp.bfloat16)

    grid = (B, P_pad // tile_p)

    pred_padded = pl.pallas_call(
        _cls_head_kernel,
        out_shape=jax.ShapeDtypeStruct((B, P_pad, Q_pad), jnp.float32),
        grid_spec=pltpu.PrefetchScalarGridSpec(
            num_scalar_prefetch=0,
            grid=grid,
            in_specs=[
                pl.BlockSpec((1, tile_p, H_pad), lambda b, p: (b, p, 0)),   # image slab tile
                pl.BlockSpec((H_pad, D_pad), lambda b, p: (0, 0)),          # dense0 weight (resident)
                pl.BlockSpec((1, D_pad), lambda b, p: (0, 0)),              # dense0 bias   (resident)
                pl.BlockSpec((1, D_pad, Q_pad), lambda b, p: (b, 0, 0)),    # normalized queries^T
            ],
            out_specs=pl.BlockSpec((1, tile_p, Q_pad), lambda b, p: (b, p, 0)),
        ),
        compiler_params=pltpu.CompilerParams(
            dimension_semantics=("parallel", "parallel"),
            vmem_limit_bytes=32 * 1024 * 1024,
        ),
    )(x_p, w_p, b_p, qT_p)

    return (None, pred_padded[:, :P, :Q])


def _reference(image_embeds, query_embeds, w_t, bias):
    img = jnp.einsum("bph,hd->bpd", image_embeds, w_t) + bias
    img = img / (jnp.linalg.norm(img, axis=-1, keepdims=True) + 1e-6)
    q = query_embeds / jnp.linalg.norm(query_embeds, axis=-1, keepdims=True) + 1e-6
    return jnp.einsum("bpd,bqd->bpq", img, q)


if __name__ == "__main__":
    key = jax.random.PRNGKey(0)
    k1, k2, k3, k4 = jax.random.split(key, 4)

    B, P, H = 2, 16, 32      # batch, num image patches, hidden dim
    Q, D = 8, 32             # num queries, query_dim (dense0: Linear(H -> D))

    image_embeds = jax.random.normal(k1, (B, P, H), dtype=jnp.float32)
    query_embeds = jax.random.normal(k2, (B, Q, D), dtype=jnp.float32)

    # dense0 parameters (synthetic): PyTorch weight is (D, H); stored pre-transposed (H, D).
    w_t = jax.random.normal(k3, (H, D), dtype=jnp.float32) * 0.05
    bias = jax.random.normal(k4, (D,), dtype=jnp.float32) * 0.01

    none_out, pred_sims = class_prediction_head(image_embeds, query_embeds, w_t, bias)
    pred_sims = jax.block_until_ready(pred_sims)

    ref = _reference(image_embeds, query_embeds, w_t, bias)
    assert none_out is None
    assert pred_sims.shape == (B, P, Q)
    max_err = float(jnp.max(jnp.abs(pred_sims - ref)))
    # bf16 matmul inputs (f32 accumulation) + approx reciprocal -> loosened tolerance.
    assert jnp.allclose(pred_sims, ref, atol=5e-2, rtol=5e-2), f"mismatch vs ref (max abs err {max_err})"

    print("KERNEL_OK")
</pallas_src>

<mosaic_0001>
module attributes {stable_mosaic.version = 11 : i64} {
  func.func @_cls_head_kernel(%arg0: i32, %arg1: i32, %arg2: memref<1x16x128xbf16, #tpu.memory_space<vmem>>, %arg3: memref<128x128xbf16, #tpu.memory_space<vmem>>, %arg4: memref<1x128xf32, #tpu.memory_space<vmem>>, %arg5: memref<1x128x128xbf16, #tpu.memory_space<vmem>>, %arg6: memref<1x16x128xf32, #tpu.memory_space<vmem>>) attributes {dimension_semantics = [#tpu.dimension_semantics<parallel>, #tpu.dimension_semantics<parallel>], iteration_bounds = array<i64: 2, 1>, scalar_prefetch = 0 : i64, scratch_operands = 0 : i64, tpu.core_type = #tpu.core_type<tc>, window_params = [{transform_indices = @transform_0, window_bounds = array<i64: 1, 16, 128>}, {pipeline_mode = #tpu.pipeline_mode<synchronous>, transform_indices = @transform_1, window_bounds = array<i64: 128, 128>}, {pipeline_mode = #tpu.pipeline_mode<synchronous>, transform_indices = @transform_2, window_bounds = array<i64: 1, 128>}, {transform_indices = @transform_3, window_bounds = array<i64: 1, 128, 128>}, {transform_indices = @transform_4, window_bounds = array<i64: 1, 16, 128>}]} {
    %c0 = arith.constant 0 : index
    %c0_0 = arith.constant 0 : index
    %c0_1 = arith.constant 0 : index
    %0 = vector.load %arg2[%c0, %c0_0, %c0_1] : memref<1x16x128xbf16, #tpu.memory_space<vmem>>, vector<1x16x128xbf16>
    %1 = vector.shape_cast %0 : vector<1x16x128xbf16> to vector<16x128xbf16>
    %c0_2 = arith.constant 0 : index
    %c0_3 = arith.constant 0 : index
    %2 = vector.load %arg3[%c0_2, %c0_3] : memref<128x128xbf16, #tpu.memory_space<vmem>>, vector<128x128xbf16>
    %c0_4 = arith.constant 0 : index
    %c0_5 = arith.constant 0 : index
    %3 = vector.load %arg4[%c0_4, %c0_5] : memref<1x128xf32, #tpu.memory_space<vmem>>, vector<1x128xf32>
    %cst = arith.constant dense<0.000000e+00> : vector<16x128xf32>
    %4 = tpu.matmul %1, %2, %cst {dimension_numbers = #tpu.dot_dimension_numbers<[1], [0], [0], [1], [0, 0, 1, 1], [], []>} : vector<16x128xbf16>, vector<128x128xbf16>, vector<16x128xf32> -> vector<16x128xf32>
    %5 = vector.broadcast %3 : vector<1x128xf32> to vector<16x128xf32>
    %6 = arith.addf %4, %5 : vector<16x128xf32>
    %7 = arith.mulf %6, %6 : vector<16x128xf32>
    %cst_6 = arith.constant dense<0.000000e+00> : vector<16xf32>
    %8 = vector.multi_reduction <add>, %7, %cst_6 [1] : vector<16x128xf32> to vector<16xf32>
    %9 = vector.shape_cast %8 : vector<16xf32> to vector<16x1xf32>
    %10 = math.sqrt %9 : vector<16x1xf32>
    %cst_7 = arith.constant 9.99999997E-7 : f32
    %11 = vector.broadcast %cst_7 : f32 to vector<16x1xf32>
    %12 = arith.addf %10, %11 : vector<16x1xf32>
    %13 = tpu.reciprocal %12 {approx = true} : vector<16x1xf32> -> vector<16x1xf32>
    %14 = vector.broadcast %13 : vector<16x1xf32> to vector<16x128xf32>
    %15 = arith.mulf %6, %14 : vector<16x128xf32>
    %16 = arith.truncf %15 : vector<16x128xf32> to vector<16x128xbf16>
    %c0_8 = arith.constant 0 : index
    %c0_9 = arith.constant 0 : index
    %c0_10 = arith.constant 0 : index
    %17 = vector.load %arg5[%c0_8, %c0_9, %c0_10] : memref<1x128x128xbf16, #tpu.memory_space<vmem>>, vector<1x128x128xbf16>
    %18 = vector.shape_cast %17 : vector<1x128x128xbf16> to vector<128x128xbf16>
    %cst_11 = arith.constant dense<0.000000e+00> : vector<16x128xf32>
    %19 = tpu.matmul %16, %18, %cst_11 {dimension_numbers = #tpu.dot_dimension_numbers<[1], [0], [0], [1], [0, 0, 1, 1], [], []>} : vector<16x128xbf16>, vector<128x128xbf16>, vector<16x128xf32> -> vector<16x128xf32>
    %c0_12 = arith.constant 0 : index
    %c0_13 = arith.constant 0 : index
    %c0_14 = arith.constant 0 : index
    %20 = vector.load %arg6[%c0_12, %c0_13, %c0_14] : memref<1x16x128xf32, #tpu.memory_space<vmem>>, vector<1x16x128xf32>
    %21 = vector.shape_cast %20 : vector<1x16x128xf32> to vector<16x128xf32>
    %22 = vector.shape_cast %19 : vector<16x128xf32> to vector<1x16x128xf32>
    tpu.vector_store %arg6[%c0_12, %c0_13, %c0_14], %22 {strides = array<i32>} : memref<1x16x128xf32, #tpu.memory_space<vmem>>, vector<1x16x128xf32>,
    return
  }
  func.func @transform_0(%arg0: i32, %arg1: i32) -> (i32, i32, i32) {
    %c0_i32 = arith.constant 0 : i32
    %c0_i32_0 = arith.constant 0 : i32
    return %arg0, %arg1, %c0_i32 : i32, i32, i32
  }
  func.func @transform_1(%arg0: i32, %arg1: i32) -> (i32, i32) {
    %c0_i32 = arith.constant 0 : i32
    %c0_i32_0 = arith.constant 0 : i32
    %c0_i32_1 = arith.constant 0 : i32
    return %c0_i32, %c0_i32_0 : i32, i32
  }
  func.func @transform_2(%arg0: i32, %arg1: i32) -> (i32, i32) {
    %c0_i32 = arith.constant 0 : i32
    %c0_i32_0 = arith.constant 0 : i32
    %c0_i32_1 = arith.constant 0 : i32
    return %c0_i32, %c0_i32_0 : i32, i32
  }
  func.func @transform_3(%arg0: i32, %arg1: i32) -> (i32, i32, i32) {
    %c0_i32 = arith.constant 0 : i32
    %c0_i32_0 = arith.constant 0 : i32
    %c0_i32_1 = arith.constant 0 : i32
    return %arg0, %c0_i32, %c0_i32_0 : i32, i32, i32
  }
  func.func @transform_4(%arg0: i32, %arg1: i32) -> (i32, i32, i32) {
    %c0_i32 = arith.constant 0 : i32
    %c0_i32_0 = arith.constant 0 : i32
    return %arg0, %arg1, %c0_i32 : i32, i32, i32
  }
}

</mosaic_0001>

<bundles_post_ra>
// kernel: tpu_custom_call.1
= control target key start
LH: loop header
LB: loop body
LE: loop exit
PB: predicated region body
PF: predicated region fallthrough
CT: control target
= control target key end

     0   :  { %9 = vsyncpa [#allocation3], 0  ;;  %s1392_s0 = inlined_call_operand.hbm [shape: bf16[2,16,128], index: 0, kind: input, shape index: {}]   ;;  %s1393_s1 = inlined_call_operand.hbm [shape: bf16[128,128], index: 1, kind: input, shape index: {}]   ;;  %s1394_s2 = inlined_call_operand.vmem [shape: f32[1,128], index: 2, kind: input, shape index: {}]   ;;  %s1395_s3 = inlined_call_operand.hbm [shape: bf16[2,128,128], index: 3, kind: input, shape index: {}]   ;;  %s1396_s4 = inlined_call_operand.hbm [shape: f32[2,16,128], index: 4, kind: output, shape index: {}]  }
   0x1   :  { %11 = vsyncpa [#allocation3 + $0x1], 0 }
   0x2   :  { %12 = vsyncpa [#allocation6], 0 }
   0x3   :  { %13 = vsyncpa [#allocation4], 0 }
   0x4   :  { %15 = vsyncpa [#allocation4 + $0x1], 0  ;;  %s1100_s15 = smov 0   ;;  %s1102_s16 = smov 0  }
   0x5   :  { %s1104_s17 = smov 0   ;;  %s1106_s18 = smov 0  }
   0x6   :  { %s1108_s19 = smov 0   ;;  %s1110_s20 = smov 0  }
   0x7 LB: > { %s33_s21 = sadd.s32 1, %s1059_s19  ;;  %s42_s22 = sadd.s32 1, %s1051_s17  ;;  %s1063_s20 = sphi %s1110_s20, %s21_s20   ;;  %s1059_s19 = sphi %s1108_s19, %s1424_s19   ;;  %s1055_s18 = sphi %s1106_s18, %s1423_s18   ;;  %s1051_s17 = sphi %s1104_s17, %s1422_s17   ;;  %s1047_s16 = sphi %s1102_s16, %s1421_s16   ;;  %s1043_s15 = sphi %s1100_s15, %s1420_s15  }
   0x8   : > { %p35_p0 = scmp.ge.s32.totalorder %s33_s21, 2  ;;  %p49_p1 = scmp.ne.s32.totalorder %s1051_s17, %s1047_s16 }
   0x9   : > { %p50_p2 = scmp.eq.s32.totalorder %s1063_s20, 0  ;;  %p802_p6 = scmp.lt.s32.totalorder %s1063_s20, 2 }
   0xa   : > { %s1426_s21 = smov (%p35_p0, %s33_s21), 0  ;;  %s191_s25 = sand.u32 1, %s1063_s20  }
   0xb   : > { %p1140_p3 = por %p50_p2, %p49_p1  ;;  %s37_s24 = ssub.s32 %s1059_s19, %s1426_s21 }
   0xc   : > { %p40_p5 = scmp.eq.s32.totalorder %s37_s24, 0  ;;  %s193_s26 = sand.u32 1, %s1051_s17  }
   0xd   : > { %s681_s28 = sshll.u32 %s193_s26, 3  ;;  %s715_s29 = sshll.u32 %s1059_s19, 7 }
   0xe   : > { %s1151_s27 = scalar_select %p40_p5, %s1051_s17, %s42_s22  }
   0xf   : > { %s1157_s6 = scalar_lea.hbm %s1392_s0, %s715_s29  ;;  %s195_s7 = scalar_lea.vmem [#allocation2], %s681_s28 }
  0x10   : > { %s204_s8 = sshll.u32 %s195_s7, 4  ;;  %p1163_p7 = pnand %p802_p6, %p1140_p3  ;;  %s1159_s8 = int_to_ptr.vmem [resolvable:$true] %s204_s8 }
  0x11   : > { %s1167_s10 = sshll.u32 %s193_s26, 6  ;;  %s1169_s11 = scalar_lea.sflag [#allocation3], %s191_s25 }
  0x12   : > { %s885_s12 = scalar_lea.hbm %s1157_s6, 128  ;;  %p887_p9 = pneg %p1163_p7 }
  0x13   : > { %p886_p8 = scmp.ne.s32.totalorder %s1157_s6, %s885_s12  ;;  %s890_s22 = scalar_lea.hbm %s1392_s0, 256 }
  0x14   : > { %p891_p12 = scmp.lt.u32.totalorder %s1157_s6, %s1392_s0  ;;  %p892_p13 = scmp.lt.u32.totalorder %s890_s22, %s885_s12 }
  0x15   : > { %p888_p10 = pnand %p887_p9, %p886_p8  ;;  %p894_p2 = scmp.lt.u32.totalorder %s885_s12, %s1157_s6 }
  0x16   : > { %p893_p0 = por %p892_p13, %p891_p12 }
  0x17   : > { %p889_p11 = pneg %p888_p10 }
  0x18   : > { %p895_p3 = por %p894_p2, %p893_p0 }
  0x1a   : > { %p896_p5 = pnand %p895_p3, %p889_p11 }
  0x1c   : > { %899 = shalt.err (!%p896_p5)
}
  0x1d   : > { %s900_s25 = scalar_lea.vmem %s1159_s8, 128  ;;  %s1065_s26 = smov [#allocation2]  }
  0x1e   : > { %p901_p6 = scmp.ne.s32.totalorder %s1159_s8, %s900_s25  ;;  %s905_s28 = sshll.u32 %s1065_s26, 4  ;;  %s906_s28 = int_to_ptr.vmem [resolvable:$false] %s905_s28 }
  0x1f   : > { %s907_s29 = scalar_lea.vmem %s906_s28, 256  ;;  %p908_p4 = scmp.lt.s32.totalorder %s1159_s8, %s906_s28 }
  0x20   : > { %p903_p8 = pnand %p901_p6, %p887_p9  ;;  %p909_p12 = scmp.lt.s32.totalorder %s907_s29, %s900_s25 }
  0x22   : > { %p904_p10 = pneg %p903_p8  ;;  %p910_p13 = por %p909_p12, %p908_p4 }
  0x24   : > { %p911_p0 = pnand %p910_p13, %p904_p10 }
  0x26   : > { %914 = shalt.err (!%p911_p0)
}
  0x27   : > { %s1398_s30 = smov 64   ;;  %s1067_s5 = smov 4  }
  0x28   : > { %793 = dma.hbm_to_vmem [thread:$0]  (!%p1163_p7), %s1157_s6, 128, %s1159_s8, %s1169_s11, %s1398_s30, %s1398_s30, %s1067_s5  }
  0x29   : > { %s218_s7 = scalar_lea.vmem [#allocation7], %s1167_s10  ;;  %s1202_s13 = sadd.s32 4294967295, %s1063_s20  }
  0x2a   : > { %s225_s12 = sshll.u32 %s218_s7, 4  ;;  %s677_s14 = sadd.s32 4294967294, %s1063_s20   ;;  %s1242_s12 = int_to_ptr.vmem [resolvable:$true] %s225_s12 }
  0x2b   : > { %p55_p4 = scmp.ne.s32.totalorder %s1047_s16, %s1043_s15  ;;  %p1397_p11 = scmp.eq.s32.totalorder %s1202_s13, 0 }
  0x2c   : > { %p149_p2 = scmp.eq.s32.totalorder %s1202_s13, 1  ;;  %p155_p3 = scmp.eq.s32.totalorder %s677_s14, 1 }
  0x2d   : > { %p1211_p5 = por %p1397_p11, %p55_p4  ;;  %p678_p6 = scmp.ge.s32.totalorder %s1063_s20, 1 }
  0x2e   : > { %p1219_p8 = por %p149_p2, %p49_p1  ;;  %p1223_p10 = por %p155_p3, %p55_p4 }
  0x2f   : > { %s1405_s22 = scalar_select %p1211_p5, 1, 0 }
  0x30   : > { %s1406_s6 = scalar_select %p1219_p8, 1, 0 }
  0x31   : > { %s1407_s8 = scalar_select %p1223_p10, 1, 0 }
  0x32   : > { %p162_p12 = scmp.lt.s32.totalorder %s1063_s20, 3  ;;  %s716_s10 = sshll.u32 %s1059_s19, 10 }
  0x33   : > { %s1068_s24 = smov [#allocation5]   ;;  %s1238_s29 = scalar_lea.hbm %s1395_s3, %s716_s10 }
  0x34   : > { %p1229_p13 = pnand %p678_p6, %p162_p12  ;;  %s1233_s25 = sshll.u32 %s1068_s24, 4  ;;  %s175_s25 = int_to_ptr.vmem [resolvable:$true] %s1233_s25 }
  0x35   : > { %s915_s7 = scalar_lea.hbm %s1238_s29, 1024  ;;  %s920_s26 = scalar_lea.hbm %s1395_s3, 2048 }
  0x36   : > { %s1408_s23 = scalar_select %p1229_p13, 1, 0 }
  0x37   : > { %p916_p0 = scmp.ne.s32.totalorder %s1238_s29, %s915_s7  ;;  %p921_p3 = scmp.lt.u32.totalorder %s1238_s29, %s1395_s3 }
  0x38   : > { %p922_p6 = scmp.lt.u32.totalorder %s920_s26, %s915_s7  ;;  %p924_p11 = scmp.lt.u32.totalorder %s915_s7, %s1238_s29 }
  0x39   : > { %p918_p4 = pnand %p916_p0, %p887_p9 }
  0x3a   : > { %p923_p12 = por %p922_p6, %p921_p3 }
  0x3b   : > { %p919_p2 = pneg %p918_p4 }
  0x3c   : > { %p925_p1 = por %p924_p11, %p923_p12 }
  0x3e   : > { %p926_p10 = pnand %p925_p1, %p919_p2 }
  0x40   : > { %929 = shalt.err (!%p926_p10)
}
  0x41   : > { %s930_s30 = scalar_lea.vmem %s1242_s12, 1024  ;;  %s1069_s14 = smov [#allocation7]  }
  0x42   : > { %p931_p0 = scmp.ne.s32.totalorder %s1242_s12, %s930_s30  ;;  %s935_s24 = sshll.u32 %s1069_s14, 4  ;;  %s936_s24 = int_to_ptr.vmem [resolvable:$false] %s935_s24 }
  0x43   : > { %s937_s10 = scalar_lea.vmem %s936_s24, 2048  ;;  %p938_p5 = scmp.lt.s32.totalorder %s1242_s12, %s936_s24 }
  0x44   : > { %p933_p4 = pnand %p931_p0, %p887_p9  ;;  %p939_p3 = scmp.lt.s32.totalorder %s937_s10, %s930_s30 }
  0x46   : > { %p934_p8 = pneg %p933_p4  ;;  %p940_p6 = por %p939_p3, %p938_p5 }
  0x48   : > { %p941_p11 = pnand %p940_p6, %p934_p8 }
  0x4a   : > { %944 = shalt.err (!%p941_p11)
}
  0x4b   : > { %s1409_s7 = smov 64   ;;  %p1410_p9 = scmp.eq.s32.totalorder %s1202_s13, 0 }
  0x4c   : > { %796 = dma.hbm_to_vmem [thread:$0]  (!%p1163_p7), %s1238_s29, 1024, %s1242_s12, %s1169_s11, %s1409_s7, %s1409_s7, %s1067_s5  }
  0x4d   : > { %p1411_p10 = pneg %p1229_p13  ;;  %s945_s28 = scalar_lea.hbm %s1393_s1, 1024 }
  0x4e   : > { %p946_p5 = scmp.ne.s32.totalorder %s1393_s1, %s945_s28  ;;  %p952_p12 = scmp.lt.u32.totalorder %s945_s28, %s1393_s1 }
  0x4f   : > { %p1277_p1 = pnand %p1411_p10, %p1410_p9 }
  0x51   : > { %p947_p8 = pneg %p1277_p1 }
  0x53   : > { %p948_p7 = pnand %p947_p8, %p946_p5 }
  0x55   : > { %p949_p2 = pneg %p948_p7 }
  0x57   : > { %p954_p0 = pnand %p952_p12, %p949_p2 }
  0x59   : > { %957 = shalt.err (!%p954_p0)
}
  0x5a   : > { %s958_s29 = scalar_lea.vmem %s175_s25, 1024  ;;  %p966_p11 = scmp.lt.s32.totalorder %s175_s25, %s175_s25 }
  0x5b   : > { %p959_p4 = scmp.ne.s32.totalorder %s175_s25, %s958_s29  ;;  %p967_p9 = scmp.lt.s32.totalorder %s958_s29, %s958_s29 }
  0x5d   : > { %p961_p3 = pnand %p959_p4, %p947_p8  ;;  %p968_p10 = por %p967_p9, %p966_p11 }
  0x5f   : > { %p962_p6 = pneg %p961_p3 }
  0x61   : > { %p969_p13 = pnand %p968_p10, %p962_p6 }
  0x63   : > { %972 = shalt.err (!%p969_p13)
}
  0x64   : > { %789 = dma.hbm_to_vmem [thread:$0]  (!%p1277_p1), %s1393_s1, 1024, %s175_s25, [#allocation6], %s1409_s7, %s1409_s7, %s1067_s5  }
  0x65   : > { %p1413_p5 = scmp.ne.s32.totalorder %s1408_s23, 0 }
  0x66   : > { %s239_s9 = sand.u32 (!%p1413_p5), 1, %s1202_s13   ;;  %s1304_s28 = sand.u32 (!%p1413_p5), 1, %s1047_s16  }
  0x67   : > { %237 = sbr.rel (%p1413_p5) target bundleno = 774 (0x306), region = 36  ;;  %s688_s14 = sshll.u32 (!%p1413_p5), %s1304_s28, 3 }
  0x68   : > { %s240_s24 = scalar_lea.sflag (!%p1413_p5), [#allocation3], %s239_s9  ;;  %s1307_s30 = scalar_lea.vmem (!%p1413_p5), [#allocation2], %s688_s14 }
  0x69   : > { %p1414_p13 = scmp.ne.s32.totalorder (!%p1413_p5), %s1405_s22, 0 }
  0x6e   : > { %1026 = dma.done.wait (%p1414_p13), %s240_s24, 128  }
  0x6f   : > { %1028 = vsyncadd (%p1414_p13), %s240_s24, 4294967168  ;;  %p1415_p1 = scmp.eq.s32.totalorder %s1202_s13, 0 }
  0x71   : > { %1030 = dma.done.wait (%p1415_p1), [#allocation6], 1024   ;;  %p1416_p8 = pmov %p1415_p1 }
  0x72   : > { %s690_s5 = sshll.u32 %s1304_s28, 6 }
  0x73   : > { %1032 = vsyncadd (%p1416_p8), [#allocation6], 4294966272  ;;  %s1318_s23 = scalar_lea.vmem [#allocation7], %s690_s5 }
  0x74   : > { %1034 = dma.done.wait (%p1414_p13), %s240_s24, 1024  }
  0x75   : > { %1036 = vsyncadd (%p1414_p13), %s240_s24, 4294966272  ;;  %v1070_v0 = vmov 0.0   ;;  %vm1071_vm0 = vmmov 0   ;;  %v860_v1 = vld [vmem:[#allocation5] sm:$0xff]   ;;  %v861_v2 = vld [vmem:[#allocation5 + $0x8] sm:$0xff]   ;;  %s691_s25 = sshll.u32 %s1304_s28, 4 }
  0x76   : > { %736 = vmatprep.subr.bf16.mxu0 %v1070_v0  ;;  %752 = vmatprep.mubr.msk.bf16.mxu0 %vm1071_vm0, %v1070_v0  ;;  %v862_v3 = vld [vmem:[#allocation5 + $0x10] sm:$0xff]   ;;  %v863_v4 = vld [vmem:[#allocation5 + $0x18] sm:$0xff]   ;;  %v864_v5 = vld [vmem:[#allocation5 + $0x20] sm:$0xff]   ;;  %s285_s7 = scalar_lea.vmem [#allocation8], %s691_s25  ;;  %s717_s12 = sshll.u32 %s1055_s18, 8 }
  0x77   : > { %756 = vmatprep.subr.bf16.mxu1 %v1070_v0  ;;  %772 = vmatprep.mubr.msk.bf16.mxu1 %vm1071_vm0, %v1070_v0  ;;  %v865_v6 = vld [vmem:[#allocation5 + $0x28] sm:$0xff]   ;;  %v866_v7 = vld [vmem:[#allocation5 + $0x30] sm:$0xff]   ;;  %v867_v8 = vld [vmem:[#allocation5 + $0x38] sm:$0xff]   ;;  %s559_s11 = sshll.u32 %s285_s7, 4  ;;  %s1343_s26 = scalar_lea.hbm %s1396_s4, %s717_s12  ;;  %s1338_s11 = int_to_ptr.vmem [resolvable:$true] %s559_s11 }
  0x78   : > { %737 = vmatpush3.bf16.msra.mxu0 %v860_v1  ;;  %v868_v9 = vld [vmem:[%s1307_s30] sm:$0xff]   ;;  %v869_v19 = vld [vmem:[%s1318_s23] sm:$0xff]   ;;  %v870_v20 = vld [vmem:[%s1318_s23 + $0x8] sm:$0xff]   ;;  %s544_s9 = scalar_lea.sflag [#allocation4], %s1304_s28  ;;  %s973_s14 = scalar_lea.vmem %s1338_s11, 256 }
  0x79   : > { %738 = vmatprep.subr.bf16.mxu0 %v1070_v0  ;;  %v692_v10 = vld [vmem:[%s1394_s2] ss:$0 sm:$0xff]  ;;  %757 = vmatpush3.bf16.msra.mxu1 %v869_v19  ;;  %v872_v22 = vld [vmem:[%s1318_s23 + $0x18] sm:$0xff]   ;;  %v873_v23 = vld [vmem:[%s1318_s23 + $0x20] sm:$0xff]   ;;  %p974_p7 = scmp.ne.s32.totalorder %s1338_s11, %s973_s14  ;;  %p1417_p2 = scmp.ne.s32.totalorder %s1406_s6, 0 }
  0x7a   : > { %758 = vmatprep.subr.bf16.mxu1 %v1070_v0  ;;  %v871_v21 = vld [vmem:[%s1318_s23 + $0x10] sm:$0xff]   ;;  %v874_v24 = vld [vmem:[%s1318_s23 + $0x28] sm:$0xff]   ;;  %v876_v26 = vld [vmem:[%s1318_s23 + $0x38] sm:$0xff]   ;;  %s1072_s18 = smov [#allocation8]  }
  0x7b   : > { %v875_v25 = vld [vmem:[%s1318_s23 + $0x30] sm:$0xff]   ;;  %p975_p12 = pnand %p974_p7, %p1417_p2  ;;  %s977_s24 = sshll.u32 %s1072_s18, 4  ;;  %s978_s24 = int_to_ptr.vmem [resolvable:$false] %s977_s24 }
  0x7c   : > { %739 = vmatpush3.bf16.msra.mxu0 %v861_v2  ;;  %s979_s30 = scalar_lea.vmem %s978_s24, 512  ;;  %p980_p4 = scmp.lt.s32.totalorder %s1338_s11, %s978_s24 }
  0x7d   : > { %740 = vmatprep.subr.bf16.mxu0 %v1070_v0  ;;  %759 = vmatpush3.bf16.msra.mxu1 %v870_v20  ;;  %p976_p0 = pneg %p975_p12  ;;  %p981_p3 = scmp.lt.s32.totalorder %s979_s30, %s973_s14 }
  0x7e   : > { %760 = vmatprep.subr.bf16.mxu1 %v1070_v0 }
  0x7f   : > { %p982_p6 = por %p981_p3, %p980_p4 }
  0x80   : > { %741 = vmatpush3.bf16.msra.mxu0 %v862_v3 }
  0x81   : > { %742 = vmatprep.subr.bf16.mxu0 %v1070_v0  ;;  %761 = vmatpush3.bf16.msra.mxu1 %v871_v21  ;;  %p983_p11 = pnand %p982_p6, %p976_p0 }
  0x82   : > { %762 = vmatprep.subr.bf16.mxu1 %v1070_v0 }
  0x84   : > { %743 = vmatpush3.bf16.msra.mxu0 %v863_v4 }
  0x85   : > { %744 = vmatprep.subr.bf16.mxu0 %v1070_v0  ;;  %763 = vmatpush3.bf16.msra.mxu1 %v872_v22 }
  0x86   : > { %764 = vmatprep.subr.bf16.mxu1 %v1070_v0 }
  0x88   : > { %745 = vmatpush3.bf16.msra.mxu0 %v864_v5 }
  0x89   : > { %746 = vmatprep.subr.bf16.mxu0 %v1070_v0  ;;  %765 = vmatpush3.bf16.msra.mxu1 %v873_v23 }
  0x8a   : > { %766 = vmatprep.subr.bf16.mxu1 %v1070_v0 }
  0x8c   : > { %747 = vmatpush3.bf16.msra.mxu0 %v865_v6 }
  0x8d   : > { %748 = vmatprep.subr.bf16.mxu0 %v1070_v0  ;;  %767 = vmatpush3.bf16.msra.mxu1 %v874_v24 }
  0x8e   : > { %768 = vmatprep.subr.bf16.mxu1 %v1070_v0 }
  0x90   : > { %749 = vmatpush3.bf16.msra.mxu0 %v866_v7 }
  0x91   : > { %750 = vmatprep.subr.bf16.mxu0 %v1070_v0  ;;  %769 = vmatpush3.bf16.msra.mxu1 %v875_v25 }
  0x92   : > { %770 = vmatprep.subr.bf16.mxu1 %v1070_v0 }
  0x94   : > { %751 = vmatpush3.bf16.msra.mxu0 %v867_v8 }
  0x95   : > { %771 = vmatpush3.bf16.msra.mxu1 %v876_v26 }
  0x97   : > { %753 = vmatmul.mubr.bf16.vlgmr.msra.gmra.mrb[0].mxu0 %v868_v9 }
 0x16a   : > { %v402_v11 = vpop.f32.mrb[0].mxu0 }
 0x16b   : > { %v403_v12 = vadd.f32 %v692_v10, %v402_v11  ;;  %v754_v13 = vpop.f32.mrb[1].mxu0 }
 0x16c   : > { %v405_v14 = vpop.f32.mrb[2].mxu0 }
 0x16d   : > { %v406_v15 = vadd.f32 %v692_v10, %v405_v14  ;;  %v755_v16 = vpop.f32.mrb[3].mxu0  ;;  %v409_v17 = vmul.f32 %v403_v12, %v403_v12 }
 0x16f   : > { %411 = vadd.xlane.f32.xlu0 %v409_v17  ;;  %v410_v18 = vmul.f32 %v406_v15, %v406_v15 }
 0x173   : > { %413 = vadd.xlane.f32.xlu0 %v410_v18 }
 0x1fc   : > { %v412_v27 = vpop.xlane.xlu0 %411 }
 0x1fd   : > { %877 = vrsqrt.f32 %v412_v27  ;;  %vm417_vm1 = vcmp.eq.f32.partialorder %v412_v27, inf  ;;  %v420_v31 = vand.u32 2147483648, %v412_v27  ;;  %vm419_vm2 = vcmp.eq.f32.partialorder %v412_v27, 0.0 }
 0x200   : > { %v414_v28 = vpop.xlane.xlu0 %413 }
 0x201   : > { %879 = vrsqrt.f32 %v414_v28  ;;  %vm424_vm3 = vcmp.eq.f32.partialorder %v414_v28, inf  ;;  %v427_v37 = vand.u32 2147483648, %v414_v28  ;;  %vm426_vm4 = vcmp.eq.f32.partialorder %v414_v28, 0.0 }
 0x207   : > { %v878_v29 = vpop.eup %877 }
 0x208   : > { %v416_v30 = vmul.f32 %v878_v29, %v412_v27 }
 0x20a   : > { %v418_v32 = vsel %vm417_vm1, %v412_v27, %v416_v30 }
 0x20b   : > { %v880_v33 = vpop.eup %879  ;;  %v421_v34 = vsel %vm419_vm2, %v420_v31, %v418_v32 }
 0x20c   : > { %v429_v35 = vadd.f32 1e-06, %v421_v34  ;;  %v423_v36 = vmul.f32 %v880_v33, %v414_v28 }
 0x20e   : > { %v425_v38 = vsel %vm424_vm3, %v414_v28, %v423_v36  ;;  %881 = vrcp.f32 %v429_v35 }
 0x20f   : > { %v428_v39 = vsel %vm426_vm4, %v427_v37, %v425_v38 }
 0x210   : > { %v430_v40 = vadd.f32 1e-06, %v428_v39 }
 0x212   : > { %883 = vrcp.f32 %v430_v40 }
 0x218   : > { %v882_v41 = vpop.eup %881 }
 0x219   : > { %v433_v43 = vmul.f32 %v882_v41, %v403_v12 }
 0x21c   : > { %v884_v42 = vpop.eup %883 }
 0x21d   : > { %v434_v44 = vmul.f32 %v884_v42, %v406_v15 }
 0x21f   : > { %v435_v45 = vpack.c.bf16 %v434_v44, %v433_v43 }
 0x221   : > { %773 = vmatmul.mubr.bf16.vlgmr.msra.gmra.mrb[0].mxu1 %v435_v45 }
 0x2f4   : > { %v534_v46 = vpop.f32.mrb[0].mxu1 }
 0x2f5   : > { %541 = vst [vmem:[%s285_s7] sm:$0xff] %v534_v46  ;;  %v774_v47 = vpop.f32.mrb[1].mxu1 }
 0x2f6   : > { %v537_v48 = vpop.f32.mrb[2].mxu1 }
 0x2f7   : > { %542 = vst [vmem:[%s285_s7 + $0x8] sm:$0xff] %v537_v48  ;;  %v775_v49 = vpop.f32.mrb[3].mxu1 }
 0x2f8   : > { %986 = shalt.err (!%p983_p11)
}
 0x2f9   : > { %s987_s5 = scalar_lea.hbm %s1343_s26, 256  ;;  %s991_s22 = scalar_lea.hbm %s1396_s4, 512 }
 0x2fa   : > { %p988_p9 = scmp.ne.s32.totalorder %s1343_s26, %s987_s5  ;;  %p992_p13 = scmp.lt.u32.totalorder %s1343_s26, %s1396_s4 }
 0x2fb   : > { %p993_p1 = scmp.lt.u32.totalorder %s991_s22, %s987_s5  ;;  %p995_p7 = scmp.lt.u32.totalorder %s987_s5, %s1343_s26 }
 0x2fc   : > { %p989_p10 = pnand %p988_p9, %p1417_p2 }
 0x2fd   : > { %p994_p8 = por %p993_p1, %p992_p13 }
 0x2fe   : > { %p990_p5 = pneg %p989_p10 }
 0x2ff   : > { %p996_p12 = por %p995_p7, %p994_p8 }
 0x301   : > { %p997_p0 = pnand %p996_p12, %p990_p5 }
 0x303   : > { %1000 = shalt.err (!%p997_p0)
}
 0x304   : > { %s1073_s12 = smov 128   ;;  %s1074_s29 = smov 8  }
 0x305   : > { %784 = dma.vmem_to_hbm [thread:$0]  (%p1417_p2), %s1338_s11, 256, %s1343_s26, %s544_s9, %s1073_s12, %s1073_s12, %s1074_s29  }
 0x306 PF: > { %s574_s10 = sand.u32 1, %s1043_s15   ;;  %p1418_p4 = scmp.ne.s32.totalorder %s1407_s8, 0 }
 0x307   : > { %p1419_p3 = scmp.ge.s32.totalorder %s1063_s20, 2  ;;  %s575_s14 = scalar_lea.sflag [#allocation4], %s574_s10 }
 0x309   : > { %p798_p6 = pnand %p1419_p3, %p1418_p4 }
 0x30b   : > { %1038 = dma.done.wait (!%p798_p6), %s575_s14, 256  }
 0x30c   : > { %1040 = vsyncadd (!%p798_p6), %s575_s14, 4294967040  ;;  %s21_s20 = sadd.s32 1, %s1063_s20   ;;  %s1420_s15 = smov %s1047_s16 }
 0x30d   : > { %p18_p11 = scmp.ge.s32.totalorder %s21_s20, 4   ;;  %s1421_s16 = smov %s1051_s17 }
 0x30e   : > { %s1422_s17 = smov %s1151_s27  ;;  %s1423_s18 = smov %s1059_s19 }
 0x30f   : > { %s1424_s19 = smov %s1426_s21  ;;  %20 = sbr.rel (!%p18_p11) target bundleno = 7 (0x7), region = 96 }
 0x316   :  { %580 = vsyncpa [#allocation3], 1 }
 0x317   :  { %582 = vsyncpa [#allocation3 + $0x1], 1 }
 0x318   :  { %583 = vsyncpa [#allocation6], 1 }
 0x319   :  { %584 = vsyncpa [#allocation4], 1 }
 0x31a   :  { %586 = vsyncpa [#allocation4 + $0x1], 1 }

</bundles_post_ra>
